<compile_context>
chip_gen: v7x
topology: tpu7x:2x2x1
jax: 0.10.0
libtpu: 0.0.40
codegen_flags: <defaults>
</compile_context>

<pallas_src>
import functools

import jax
import jax.numpy as jnp
from jax import lax
from jax.experimental import pallas as pl
from jax.experimental.pallas import tpu as pltpu


def _round_up(x, m):
    return (x + m - 1) // m * m


def _cdiv(a, b):
    return (a + b - 1) // b


def _conv1d_fold_kernel(x_ref, w_ref, b_ref, o_ref, *, ksize, dilation, tl):
    """Folded-tap step: one deep-contraction MXU matmul per grid point.

    x_ref: (1, L_in_pad, C_in)     padded sequence (resident per batch element)
    w_ref: (K*C_in, C_out_tile)    folded weights for this C_out tile
    b_ref: (1, C_out_tile)         bias, f32
    o_ref: (1, TL, C_out_tile)     output tile
    """
    j = pl.program_id(2)
    base = pl.multiple_of(j * tl, tl)           # element offset of this L tile
    taps = [x_ref[0, pl.ds(base + k * dilation, tl), :] for k in range(ksize)]
    lhs = taps[0] if ksize == 1 else jnp.concatenate(taps, axis=-1)  # (TL, K*C_in)
    acc = jnp.dot(lhs, w_ref[...], preferred_element_type=jnp.float32)
    acc = acc + b_ref[...].astype(jnp.float32)                       # (1, C_out_t) bcast
    o_ref[0] = acc.astype(o_ref.dtype)


def _conv1d_tap_kernel(x_ref, w_ref, b_ref, o_ref, *, ksize, dilation, tl):
    """Per-tap step (used when C_in already fills the MXU contraction depth).

    w_ref: (K, C_in, C_out_tile)
    """
    j = pl.program_id(2)
    base = pl.multiple_of(j * tl, tl)
    c_t = o_ref.shape[-1]
    # Bias folded into the accumulator init (saves one VPU pass per step).
    acc = jnp.broadcast_to(b_ref[...].astype(jnp.float32), (tl, c_t))
    for k in range(ksize):                       # statically unrolled taps
        xk = x_ref[0, pl.ds(base + k * dilation, tl), :]             # (TL, C_in)
        acc = acc + jnp.dot(xk, w_ref[k], preferred_element_type=jnp.float32)
    o_ref[0] = acc.astype(o_ref.dtype)


def conv_norm_forward(signal, weight, bias, *, stride=1, padding=None, dilation=1,
                      compute_dtype=jnp.bfloat16, tile_l=256, fold_taps=None):
    """Pallas implementation of ConvNorm.forward.

    signal: (B, C_in, L)        -- PyTorch NCL layout
    weight: (C_out, C_in, K)    -- PyTorch Conv1d weight layout
    bias:   (C_out,)
    returns (B, C_out, L_out)

    compute_dtype: bf16 by default (MXU inputs; f32 accumulate). Pass
    jnp.float32 for tighter parity with the f32 PyTorch module.
    """
    B, C_in, L = signal.shape
    C_out, _, K = weight.shape
    if padding is None:
        assert K % 2 == 1
        padding = int(dilation * (K - 1) / 2)

    # Output length of the (possibly strided) conv, and of the stride-1 conv
    # the kernel actually computes.
    l_out = (L + 2 * padding - dilation * (K - 1) - 1) // stride + 1
    l_out1 = L + 2 * padding - dilation * (K - 1)

    # ---- tiling -------------------------------------------------------------
    c_out_pad = _round_up(C_out, 128)            # lane-dense output stores
    # N=256 output tiles feed the 2x256^2 MXUs on v6e/v7x; 128 otherwise/v5e.
    c_out_tile = 256 if c_out_pad % 256 == 0 else 128
    n_c = c_out_pad // c_out_tile

    # f32 accumulator tile capped at <=128 KiB so it stays vreg/VMEM cheap
    # (the vreg file is only 256 KiB total).
    tl_cap = max(16, ((128 * 1024) // (4 * c_out_tile)) // 16 * 16)
    tl = min(int(tile_l), tl_cap, _round_up(l_out1, 16))
    tl = max(16, tl // 16 * 16)                  # bf16-friendly sublane multiple
    # Ensure a handful of grid steps for pipelining and both v7x TensorCores.
    while tl > 16 and B * n_c * _cdiv(l_out1, tl) < 8:
        tl = max(16, (tl // 2) // 16 * 16)
    n_tiles = _cdiv(l_out1, tl)
    l_out_pad = n_tiles * tl
    # Padded-input length so the last tile's taps stay in bounds.
    l_in_pad = _round_up(l_out_pad + dilation * (K - 1), 16)

    # Fold the K taps into a single matmul when the folded contraction is
    # shallow enough to benefit (narrow-channel layers).
    if fold_taps is None:
        fold_taps = (C_in < 256) and (K * C_in <= 640)

    # ---- layout / padding glue (plain JAX) -----------------------------------
    x_nlc = jnp.transpose(signal, (0, 2, 1))                           # (B, L, C_in)
    pad_hi = padding + (l_in_pad - (L + 2 * padding))
    x_pad = jnp.pad(x_nlc, ((0, 0), (padding, pad_hi), (0, 0)))
    x_pad = x_pad.astype(compute_dtype)
    w_kio = jnp.transpose(weight, (2, 1, 0)).astype(compute_dtype)     # (K, C_in, C_out)
    w_kio = jnp.pad(w_kio, ((0, 0), (0, 0), (0, c_out_pad - C_out)))
    b_2d = jnp.pad(bias.astype(jnp.float32),
                   (0, c_out_pad - C_out)).reshape(1, c_out_pad)

    if fold_taps:
        w_arg = w_kio.reshape(K * C_in, c_out_pad)
        w_spec = pl.BlockSpec((K * C_in, c_out_tile), lambda b, c, j: (0, c))
        kernel = functools.partial(_conv1d_fold_kernel,
                                   ksize=K, dilation=dilation, tl=tl)
    else:
        w_arg = w_kio
        w_spec = pl.BlockSpec((K, C_in, c_out_tile), lambda b, c, j: (0, 0, c))
        kernel = functools.partial(_conv1d_tap_kernel,
                                   ksize=K, dilation=dilation, tl=tl)

    # ---- generation-aware VMEM budget ----------------------------------------
    csize = jnp.dtype(compute_dtype).itemsize
    osize = jnp.dtype(signal.dtype).itemsize
    needed = (2 * (l_in_pad * C_in * csize               # resident input (2 bufs)
                   + K * C_in * c_out_tile * csize       # weight tile
                   + c_out_tile * 4                      # bias tile
                   + tl * c_out_tile * osize)            # output tile
              + tl * c_out_tile * 4                      # f32 accumulator
              + (tl * K * C_in * csize if fold_taps else 0))  # folded LHS
    try:
        vmem_cap = int(pltpu.get_tpu_info().vmem_capacity_bytes)
    except Exception:
        vmem_cap = 64 * 2**20                            # conservative: v7x per-TC
    vmem_limit = min(max(needed + 4 * 2**20, 16 * 2**20), int(0.45 * vmem_cap))
    vmem_limit = max(vmem_limit, min(needed + 2 * 2**20, int(0.9 * vmem_cap)))

    out_nlc = pl.pallas_call(
        kernel,
        out_shape=jax.ShapeDtypeStruct((B, l_out_pad, c_out_pad), signal.dtype),
        grid_spec=pltpu.PrefetchScalarGridSpec(
            num_scalar_prefetch=0,
            grid=(B, n_c, n_tiles),
            in_specs=[
                pl.BlockSpec((1, l_in_pad, C_in), lambda b, c, j: (b, 0, 0)),
                w_spec,
                pl.BlockSpec((1, c_out_tile), lambda b, c, j: (0, c)),
            ],
            out_specs=pl.BlockSpec((1, tl, c_out_tile), lambda b, c, j: (b, j, c)),
        ),
        compiler_params=pltpu.CompilerParams(
            dimension_semantics=("parallel", "parallel", "parallel"),
            vmem_limit_bytes=int(vmem_limit),
        ),
    )(x_pad, w_arg, b_2d)

    # Drop L/C_out padding, realize stride by subsampling, back to NCL.
    out = out_nlc[:, : (l_out - 1) * stride + 1 : stride, :C_out]
    return jnp.transpose(out, (0, 2, 1))                               # (B, C_out, L_out)


def init_conv_norm_params(key, in_channels, out_channels, kernel_size,
                          w_init_gain="linear"):
    """Deterministic parameter init matching ConvNorm.__init__ semantics."""
    kw, kb = jax.random.split(key)
    # xavier_uniform_ with gain = calculate_gain('linear') = 1.0
    gain = 1.0
    fan_in = in_channels * kernel_size
    fan_out = out_channels * kernel_size
    a = gain * jnp.sqrt(6.0 / (fan_in + fan_out))
    weight = jax.random.uniform(
        kw, (out_channels, in_channels, kernel_size),
        minval=-a, maxval=a, dtype=jnp.float32)
    # PyTorch Conv1d default bias init: U(-1/sqrt(fan_in), 1/sqrt(fan_in))
    bound = 1.0 / jnp.sqrt(fan_in)
    bias = jax.random.uniform(
        kb, (out_channels,), minval=-bound, maxval=bound, dtype=jnp.float32)
    return weight, bias


def _reference_conv1d(signal, weight, bias, *, stride, padding, dilation):
    out = lax.conv_general_dilated(
        signal, weight,
        window_strides=(stride,),
        padding=[(padding, padding)],
        rhs_dilation=(dilation,),
        dimension_numbers=("NCH", "OIH", "NCH"),
    )
    return out + bias[None, :, None]


if __name__ == "__main__":
    key = jax.random.PRNGKey(0)
    k_x, k_p = jax.random.split(key)

    # Small shapes consistent with ConvNorm (Conv1d on NCL input).
    B, C_in, L = 2, 4, 16
    C_out, K = 8, 5

    signal = jax.random.normal(k_x, (B, C_in, L), dtype=jnp.float32)
    weight, bias = init_conv_norm_params(k_p, C_in, C_out, K)

    # f32 compute path: tight check across stride / dilation / fold configs.
    for cfg in (dict(stride=1, dilation=1),
                dict(stride=1, dilation=2),
                dict(stride=2, dilation=1),
                dict(stride=1, dilation=1, fold_taps=False)):
        fold = cfg.pop("fold_taps", None)
        padding = int(cfg["dilation"] * (K - 1) / 2)
        ref = _reference_conv1d(signal, weight, bias, padding=padding, **cfg)
        out = conv_norm_forward(signal, weight, bias, padding=padding,
                                compute_dtype=jnp.float32, fold_taps=fold, **cfg)
        out = jax.block_until_ready(out)
        assert out.shape == ref.shape, (out.shape, ref.shape)
        assert jnp.allclose(out, ref, atol=1e-4, rtol=1e-4)

    # Default bf16 MXU path (looser tolerance for the bf16 input/weight cast).
    padding = int((K - 1) / 2)
    ref = _reference_conv1d(signal, weight, bias, stride=1,
                            padding=padding, dilation=1)
    out_bf16 = conv_norm_forward(signal, weight, bias, stride=1,
                                 padding=padding, dilation=1)
    out_bf16 = jax.block_until_ready(out_bf16)
    assert out_bf16.shape == ref.shape == (B, C_out, L)
    assert jnp.allclose(out_bf16, ref, atol=5e-2, rtol=5e-2)

    print("KERNEL_OK")
</pallas_src>

<mosaic_0001>
module attributes {stable_mosaic.version = 11 : i64} {
  func.func @_conv1d_fold_kernel(%arg0: i32, %arg1: i32, %arg2: i32, %arg3: memref<1x32x4xf32, #tpu.memory_space<vmem>>, %arg4: memref<20x128xf32, #tpu.memory_space<vmem>>, %arg5: memref<1x128xf32, #tpu.memory_space<vmem>>, %arg6: memref<1x16x128xf32, #tpu.memory_space<vmem>>) attributes {dimension_semantics = [#tpu.dimension_semantics<parallel>, #tpu.dimension_semantics<parallel>, #tpu.dimension_semantics<parallel>], iteration_bounds = array<i64: 2, 1, 1>, scalar_prefetch = 0 : i64, scratch_operands = 0 : i64, tpu.core_type = #tpu.core_type<tc>, window_params = [{transform_indices = @transform_0, window_bounds = array<i64: 1, 32, 4>}, {transform_indices = @transform_1, window_bounds = array<i64: 20, 128>}, {transform_indices = @transform_2, window_bounds = array<i64: 1, 128>}, {transform_indices = @transform_3, window_bounds = array<i64: 1, 16, 128>}]} {
    %c16_i32 = arith.constant 16 : i32
    %0 = arith.muli %arg2, %c16_i32 : i32
    %1 = tpu.assume_multiple %0, 16 : i32
    %c0_i32 = arith.constant 0 : i32
    %2 = arith.addi %1, %c0_i32 : i32
    %c0 = arith.constant 0 : index
    %3 = arith.index_cast %2 : i32 to index
    %c0_0 = arith.constant 0 : index
    %4 = vector.load %arg3[%c0, %3, %c0_0] : memref<1x32x4xf32, #tpu.memory_space<vmem>>, vector<1x16x4xf32>
    %5 = vector.shape_cast %4 : vector<1x16x4xf32> to vector<16x4xf32>
    %c1_i32 = arith.constant 1 : i32
    %6 = arith.addi %1, %c1_i32 : i32
    %c0_1 = arith.constant 0 : index
    %7 = arith.index_cast %6 : i32 to index
    %c0_2 = arith.constant 0 : index
    %8 = vector.load %arg3[%c0_1, %7, %c0_2] : memref<1x32x4xf32, #tpu.memory_space<vmem>>, vector<1x16x4xf32>
    %9 = vector.shape_cast %8 : vector<1x16x4xf32> to vector<16x4xf32>
    %c2_i32 = arith.constant 2 : i32
    %10 = arith.addi %1, %c2_i32 : i32
    %c0_3 = arith.constant 0 : index
    %11 = arith.index_cast %10 : i32 to index
    %c0_4 = arith.constant 0 : index
    %12 = vector.load %arg3[%c0_3, %11, %c0_4] : memref<1x32x4xf32, #tpu.memory_space<vmem>>, vector<1x16x4xf32>
    %13 = vector.shape_cast %12 : vector<1x16x4xf32> to vector<16x4xf32>
    %c3_i32 = arith.constant 3 : i32
    %14 = arith.addi %1, %c3_i32 : i32
    %c0_5 = arith.constant 0 : index
    %15 = arith.index_cast %14 : i32 to index
    %c0_6 = arith.constant 0 : index
    %16 = vector.load %arg3[%c0_5, %15, %c0_6] : memref<1x32x4xf32, #tpu.memory_space<vmem>>, vector<1x16x4xf32>
    %17 = vector.shape_cast %16 : vector<1x16x4xf32> to vector<16x4xf32>
    %c4_i32 = arith.constant 4 : i32
    %18 = arith.addi %1, %c4_i32 : i32
    %c0_7 = arith.constant 0 : index
    %19 = arith.index_cast %18 : i32 to index
    %c0_8 = arith.constant 0 : index
    %20 = vector.load %arg3[%c0_7, %19, %c0_8] : memref<1x32x4xf32, #tpu.memory_space<vmem>>, vector<1x16x4xf32>
    %21 = vector.shape_cast %20 : vector<1x16x4xf32> to vector<16x4xf32>
    %22 = tpu.concatenate %5, %9, %13, %17, %21 in 1 : vector<16x4xf32>, vector<16x4xf32>, vector<16x4xf32>, vector<16x4xf32>, vector<16x4xf32> -> vector<16x20xf32>
    %c0_9 = arith.constant 0 : index
    %c0_10 = arith.constant 0 : index
    %23 = vector.load %arg4[%c0_9, %c0_10] : memref<20x128xf32, #tpu.memory_space<vmem>>, vector<20x128xf32>
    %cst = arith.constant dense<0.000000e+00> : vector<16x128xf32>
    %24 = tpu.matmul %22, %23, %cst {dimension_numbers = #tpu.dot_dimension_numbers<[1], [0], [0], [1], [0, 0, 1, 1], [], []>} : vector<16x20xf32>, vector<20x128xf32>, vector<16x128xf32> -> vector<16x128xf32>
    %c0_11 = arith.constant 0 : index
    %c0_12 = arith.constant 0 : index
    %25 = vector.load %arg5[%c0_11, %c0_12] : memref<1x128xf32, #tpu.memory_space<vmem>>, vector<1x128xf32>
    %26 = vector.broadcast %25 : vector<1x128xf32> to vector<16x128xf32>
    %27 = arith.addf %24, %26 : vector<16x128xf32>
    %c0_13 = arith.constant 0 : index
    %c0_14 = arith.constant 0 : index
    %c0_15 = arith.constant 0 : index
    %28 = vector.load %arg6[%c0_13, %c0_14, %c0_15] : memref<1x16x128xf32, #tpu.memory_space<vmem>>, vector<1x16x128xf32>
    %29 = vector.shape_cast %28 : vector<1x16x128xf32> to vector<16x128xf32>
    %30 = vector.shape_cast %27 : vector<16x128xf32> to vector<1x16x128xf32>
    tpu.vector_store %arg6[%c0_13, %c0_14, %c0_15], %30 {strides = array<i32>} : memref<1x16x128xf32, #tpu.memory_space<vmem>>, vector<1x16x128xf32>,
    return
  }
  func.func @transform_0(%arg0: i32, %arg1: i32, %arg2: i32) -> (i32, i32, i32) {
    %c0_i32 = arith.constant 0 : i32
    %c0_i32_0 = arith.constant 0 : i32
    %c0_i32_1 = arith.constant 0 : i32
    return %arg0, %c0_i32, %c0_i32_0 : i32, i32, i32
  }
  func.func @transform_1(%arg0: i32, %arg1: i32, %arg2: i32) -> (i32, i32) {
    %c0_i32 = arith.constant 0 : i32
    %c0_i32_0 = arith.constant 0 : i32
    return %c0_i32, %arg1 : i32, i32
  }
  func.func @transform_2(%arg0: i32, %arg1: i32, %arg2: i32) -> (i32, i32) {
    %c0_i32 = arith.constant 0 : i32
    %c0_i32_0 = arith.constant 0 : i32
    return %c0_i32, %arg1 : i32, i32
  }
  func.func @transform_3(%arg0: i32, %arg1: i32, %arg2: i32) -> (i32, i32, i32) {
    %c0_i32 = arith.constant 0 : i32
    return %arg0, %arg2, %arg1 : i32, i32, i32
  }
}

</mosaic_0001>

<bundles_post_ra>
// kernel: tpu_custom_call.1
= control target key start
LH: loop header
LB: loop body
LE: loop exit
PB: predicated region body
PF: predicated region fallthrough
CT: control target
= control target key end

     0   :  { %8 = vsyncpa [#allocation3], 0  ;;  %s876_s0 = inlined_call_operand.vmem [shape: f32[2,32,4], index: 0, kind: input, shape index: {}]   ;;  %s877_s1 = inlined_call_operand.vmem [shape: f32[20,128], index: 1, kind: input, shape index: {}]   ;;  %s878_s2 = inlined_call_operand.vmem [shape: f32[1,128], index: 2, kind: input, shape index: {}]   ;;  %s879_s3 = inlined_call_operand.hbm [shape: f32[2,16,128], index: 3, kind: output, shape index: {}]  }
   0x1   :  { %10 = vsyncpa [#allocation3 + $0x1], 0  ;;  %s734_s12 = smov 0   ;;  %s736_s13 = smov 0  }
   0x2   :  { %s738_s14 = smov 0   ;;  %s740_s15 = smov 0  }
   0x3   :  { %s742_s16 = smov 0   ;;  %s744_s17 = smov 0  }
   0x4 LB: > { %s521_s18 = sadd.s32 4294967295, %s706_s17   ;;  %s522_s19 = sadd.s32 4294967294, %s706_s17   ;;  %s706_s17 = sphi %s744_s17, %s16_s17   ;;  %s702_s16 = sphi %s742_s16, %s886_s16   ;;  %s698_s15 = sphi %s740_s15, %s885_s15   ;;  %s694_s14 = sphi %s738_s14, %s884_s14   ;;  %s690_s13 = sphi %s736_s13, %s883_s13   ;;  %s686_s12 = sphi %s734_s12, %s882_s12  }
   0x5   : > { %s35_s20 = sadd.s32 1, %s702_s16  ;;  %s124_s21 = sadd.s32 1, %s694_s14 }
   0x6   : > { %p37_p0 = scmp.ge.s32.totalorder %s35_s20, 2  ;;  %p134_p1 = scmp.ne.s32.totalorder %s694_s14, %s690_s13 }
   0x7   : > { %p135_p2 = scmp.eq.s32.totalorder %s521_s18, 1  ;;  %p140_p3 = scmp.ne.s32.totalorder %s690_s13, %s686_s12 }
   0x8   : > { %s888_s20 = smov (%p37_p0, %s35_s20), 0  ;;  %p141_p5 = scmp.eq.s32.totalorder %s522_s19, 1 }
   0x9   : > { %p774_p4 = por %p135_p2, %p134_p1  ;;  %s117_s23 = ssub.s32 %s702_s16, %s888_s20 }
   0xa   : > { %p527_p6 = scmp.ge.s32.totalorder %s706_s17, 1  ;;  %p122_p7 = scmp.eq.s32.totalorder %s117_s23, 0 }
   0xb   : > { %p781_p8 = por %p141_p5, %p140_p3  ;;  %p180_p9 = scmp.lt.s32.totalorder %s706_s17, 3 }
   0xc   : > { %s787_s25 = scalar_select %p122_p7, %s694_s14, %s124_s21  }
   0xd   : > { %p181_p10 = pnand %p527_p6, %p180_p9 }
   0xe   : > { %p211_p11 = scmp.lt.s32.totalorder (!%p181_p10), %s698_s15, 1  ;;  %v288_v0 = vld [vmem:[%s877_s1] sm:$0xff] (!%p181_p10)  ;;  %v289_v1 = vld [vmem:[%s877_s1 + $0x8] sm:$0xff] (!%p181_p10)  ;;  %v290_v3 = vld [vmem:[%s877_s1 + $0x10] sm:$0xf] (!%p181_p10)  ;;  %vm305_vm0 = vcmask (!%p181_p10), 1043456  }
   0xf   : > { %184 = sbr.rel (%p181_p10) target bundleno = 387 (0x183), region = 32  ;;  %v564_v2 = vpack.c.bf16 (!%p181_p10), %v289_v1, %v288_v0  ;;  %s708_s10 = smov (!%p181_p10), 8   ;;  %vm276_vm1 = vcmask (!%p181_p10), 31744   ;;  %vm279_vm2 = vcmask (!%p181_p10), 64512   ;;  %vm282_vm3 = vcmask (!%p181_p10), 97280  }
  0x10   : > { %s709_s11 = smov (!%p181_p10), 4   ;;  %s710_s18 = smov (!%p181_p10), 12   ;;  %vm285_vm4 = vcmask (!%p181_p10), 130048   ;;  %vm298_vm5 = vcmask (!%p181_p10), 162816   ;;  %v539_v30 = vld [vmem:[%s878_s2] ss:$0 sm:$0xff] (!%p181_p10) }
  0x11   : > { %565 = vmatprep.subr.bf16.mxu0 (!%p181_p10), %v564_v2  ;;  %s711_s19 = smov (!%p181_p10), 16   ;;  %s208_s21 = sand.u32 (!%p181_p10), 1, %s690_s13  }
  0x12   : > { %567 = vmatpush3.bf16.msra.mxu0 (!%p181_p10), %v564_v2  ;;  %s528_s23 = sshll.u32 (!%p181_p10), %s208_s21, 4 }
  0x13   : > { %559 = vmatprep.subr.msk.mxu0 (!%p181_p10), %vm305_vm0, %v290_v3  ;;  %s210_s28 = scalar_lea.vmem (!%p181_p10), [#allocation2], %s528_s23 }
  0x14   : > { %s403_s29 = sshll.u32 (!%p181_p10), %s210_s28, 4  ;;  %s822_s29 = int_to_ptr.vmem [resolvable:$true] %s403_s29 }
  0x15   : > { %s628_s8 = scalar_lea.vmem (!%p181_p10), %s822_s29, 256 }
  0x16   : > { %s212_s30 = scalar_select %p211_p11, %s698_s15, 1  ;;  %560 = vmatpush3.msk.msra.mxu0 %vm305_vm0, %v290_v3 }
  0x17   : > { %p629_p12 = scmp.ne.s32.totalorder %s822_s29, %s628_s8 }
  0x18   : > { %s548_s4 = sshll.u32 %s212_s30, 5  ;;  %s549_s30 = sshll.u32 %s698_s15, 8 }
  0x19   : > { %s800_s7 = scalar_lea.vmem %s876_s0, %s548_s4  ;;  %s827_s6 = scalar_lea.hbm %s879_s3, %s549_s30 }
  0x1a   : > { %v533_v4 = vld [vmem:[%s800_s7 + $0x2] sm:$0xff]  ;;  %v534_v6 = vld [vmem:[%s800_s7 + $0xa] sm:$0xff]  ;;  %p630_p13 = pnand %p629_p12, %p774_p4  ;;  %s712_s15 = smov [#allocation2]  }
  0x1b   : > { %v531_v5 = vld [vmem:[%s800_s7 + $0x1] sm:$0xff]  ;;  %254 = vrot.lane.b32.xlu1 %v533_v4, %s708_s10  ;;  %v532_v7 = vld [vmem:[%s800_s7 + $0x9] sm:$0xff]  ;;  %s632_s9 = sshll.u32 %s712_s15, 4  ;;  %s633_s9 = int_to_ptr.vmem [resolvable:$false] %s632_s9 }
  0x1c   : > { %246 = vrot.lane.b32.xlu0 %v531_v5, %s709_s11  ;;  %v536_v8 = vld [vmem:[%s800_s7 + $0xb] sm:$0xff]  ;;  %v535_v9 = vld [vmem:[%s800_s7 + $0x3] sm:$0xff]  ;;  %p631_p0 = pneg %p630_p13  ;;  %p635_p1 = scmp.lt.s32.totalorder %s822_s29, %s633_s9 }
  0x1d   : > { %v538_v10 = vld [vmem:[%s800_s7 + $0xc] sm:$0xff]  ;;  %v537_v11 = vld [vmem:[%s800_s7 + $0x4] sm:$0xff] }
  0x1e   : > { %v226_v16 = vld [vmem:[%s800_s7] sm:$0xff]  ;;  %v227_v17 = vld [vmem:[%s800_s7 + $0x8] sm:$0xff]  ;;  %s829_s7 = scalar_lea.sflag [#allocation3], %s208_s21 }
  0x1f   : > { %256 = vrot.lane.b32.xlu1 %v534_v6, %s708_s10 }
  0x20   : > { %248 = vrot.lane.b32.xlu0 %v532_v7, %s709_s11  ;;  %s634_s11 = scalar_lea.vmem %s633_s9, 512 }
  0x21   : > { %p636_p2 = scmp.lt.s32.totalorder %s634_s11, %s628_s8 }
  0x23   : > { %264 = vrot.lane.b32.xlu1 %v536_v8, %s710_s18  ;;  %p637_p3 = por %p636_p2, %p635_p1 }
  0x24   : > { %262 = vrot.lane.b32.xlu0 %v535_v9, %s710_s18 }
  0x25   : > { %p638_p5 = pnand %p637_p3, %p631_p0 }
  0x27   : > { %272 = vrot.lane.b32.xlu1 %v538_v10, %s711_s19 }
  0x28   : > { %270 = vrot.lane.b32.xlu0 %v537_v11, %s711_s19 }
  0x8d   : > { %v255_v12 = vpop.permute.xlu1 %254 }
  0x8e   : > { %v247_v13 = vpop.permute.xlu0 %246 }
  0x8f   : > { %v277_v18 = vsel %vm276_vm1, %v226_v16, %v247_v13 }
  0x90   : > { %v280_v23 = vsel %vm279_vm2, %v277_v18, %v255_v12 }
  0x91   : > { %v257_v14 = vpop.permute.xlu1 %256 }
  0x92   : > { %v249_v15 = vpop.permute.xlu0 %248 }
  0x93   : > { %v278_v19 = vsel %vm276_vm1, %v227_v17, %v249_v15 }
  0x94   : > { %v281_v22 = vsel %vm279_vm2, %v278_v19, %v257_v14 }
  0x95   : > { %v265_v20 = vpop.permute.xlu1 %264 }
  0x96   : > { %v263_v21 = vpop.permute.xlu0 %262  ;;  %v284_v24 = vsel %vm282_vm3, %v281_v22, %v265_v20 }
  0x97   : > { %v283_v25 = vsel %vm282_vm3, %v280_v23, %v263_v21 }
  0x99   : > { %v273_v26 = vpop.permute.xlu1 %272 }
  0x9a   : > { %v271_v27 = vpop.permute.xlu0 %270  ;;  %v287_v28 = vsel %vm285_vm4, %v284_v24, %v273_v26 }
  0x9b   : > { %v286_v29 = vsel %vm285_vm4, %v283_v25, %v271_v27 }
  0x9c   : > { %561 = vmatprep.mubr.msk.f32.mxu0 %vm298_vm5, %v286_v29 }
  0x9d   : > { %562 = vmatmul.mubr.msk.f32.vlgmr.msra.gmra.mrb[0].mxu0 %vm298_vm5, %v287_v28 }
 0x170   : > { %v563_v31 = vpop.f32.mrb[0].mxu0 }
 0x171   : > { %v381_v32 = vadd.f32 %v563_v31, %v539_v30  ;;  %v375_v33 = vpop.f32.mrb[1].mxu0 }
 0x172   : > { %v376_v34 = vadd.f32 %v539_v30, %v375_v33 }
 0x173   : > { %385 = vst [vmem:[%s210_s28 + $0x8] sm:$0xff] %v381_v32 }
 0x174   : > { %384 = vst [vmem:[%s210_s28] sm:$0xff] %v376_v34 }
 0x175   : > { %641 = shalt.err (!%p638_p5)
}
 0x176   : > { %s642_s18 = scalar_lea.hbm %s827_s6, 256  ;;  %s646_s23 = scalar_lea.hbm %s879_s3, 512 }
 0x177   : > { %p643_p6 = scmp.ne.s32.totalorder %s827_s6, %s642_s18  ;;  %p647_p10 = scmp.lt.u32.totalorder %s827_s6, %s879_s3 }
 0x178   : > { %p648_p11 = scmp.lt.u32.totalorder %s646_s23, %s642_s18  ;;  %p650_p13 = scmp.lt.u32.totalorder %s642_s18, %s827_s6 }
 0x179   : > { %p644_p7 = pnand %p643_p6, %p774_p4 }
 0x17a   : > { %p649_p12 = por %p648_p11, %p647_p10 }
 0x17b   : > { %p645_p9 = pneg %p644_p7 }
 0x17c   : > { %p651_p0 = por %p650_p13, %p649_p12 }
 0x17e   : > { %p652_p1 = pnand %p651_p0, %p645_p9 }
 0x180   : > { %655 = shalt.err (!%p652_p1)
}
 0x181   : > { %s713_s28 = smov 128  }
 0x182   : > { %568 = dma.vmem_to_hbm [thread:$0]  (%p774_p4), %s822_s29, 256, %s827_s6, %s829_s7, %s713_s28, %s713_s28, %s708_s10  }
 0x183 PF: > { %p574_p2 = scmp.ge.s32.totalorder %s706_s17, 2  ;;  %s418_s30 = sand.u32 1, %s686_s12  }
 0x184   : > { %s419_s4 = scalar_lea.sflag [#allocation3], %s418_s30 }
 0x185   : > { %p571_p3 = pnand %p574_p2, %p781_p8 }
 0x187   : > { %681 = dma.done.wait (!%p571_p3), %s419_s4, 256  }
 0x188   : > { %683 = vsyncadd (!%p571_p3), %s419_s4, 4294967040  ;;  %s16_s17 = sadd.s32 1, %s706_s17   ;;  %s882_s12 = smov %s690_s13 }
 0x189   : > { %p13_p5 = scmp.ge.s32.totalorder %s16_s17, 4   ;;  %s883_s13 = smov %s694_s14 }
 0x18a   : > { %s884_s14 = smov %s787_s25  ;;  %s885_s15 = smov %s702_s16 }
 0x18b   : > { %s886_s16 = smov %s888_s20  ;;  %15 = sbr.rel (!%p13_p5) target bundleno = 4 (0x4), region = 78 }
 0x192   :  { %424 = vsyncpa [#allocation3], 1 }
 0x193   :  { %426 = vsyncpa [#allocation3 + $0x1], 1 }

</bundles_post_ra>
